<compile_context>
chip_gen: v5e
topology: v5e:2x2
jax: 0.10.0
libtpu: 0.0.40
codegen_flags: <defaults>
</compile_context>

<pallas_src>
import functools

import jax
import jax.numpy as jnp
import numpy as np
from jax.experimental import pallas as pl
from jax.experimental.pallas import tpu as pltpu

NEG_SLOPE = 0.01   # F.leaky_relu default
BN_EPS = 1e-6
LANE = 128


def _leaky_relu(x):
    return jnp.where(x >= 0, x, NEG_SLOPE * x)


def _round_up(x, m):
    return (x + m - 1) // m * m


# --------------------------------------------------------------------------- #
# Pass 1: fused projections (pre-BN) + one-pass BN statistics accumulation.   #
# --------------------------------------------------------------------------- #
def fused_proj_stats_kernel(af_ref, bf_ref, an_ref, bn_ref,
                            atom_w_ref, atom_b_ref,
                            nei_wa_ref, nei_wb_ref, nei_b_ref,
                            h_atom_ref, h_nei_ref, stats_ref):
    TB, A, Fa = af_ref.shape
    _, Nb, Fb = bf_ref.shape
    _, _, N = an_ref.shape
    FPp = h_atom_ref.shape[-1]

    @pl.when(pl.program_id(0) == 0)
    def _init():
        stats_ref[...] = jnp.zeros_like(stats_ref)

    # ---- atom path: one big GEMM over collapsed (TB*A) rows ----------------
    x_a = af_ref[...].astype(jnp.bfloat16).reshape(TB * A, Fa)
    h_atom = jnp.dot(x_a, atom_w_ref[...],
                     preferred_element_type=jnp.float32) + atom_b_ref[...]
    h_atom_ref[...] = h_atom.reshape(TB, A, FPp)

    # ---- neighbor path: project first (A / Nb rows), gather afterwards -----
    p_na = jnp.dot(x_a, nei_wa_ref[...], preferred_element_type=jnp.float32)
    p_na = p_na.reshape(TB, A, FPp).astype(jnp.bfloat16)

    x_b = bf_ref[...].astype(jnp.bfloat16).reshape(TB * Nb, Fb)
    p_nb = jnp.dot(x_b, nei_wb_ref[...], preferred_element_type=jnp.float32)
    p_nb = p_nb.reshape(TB, Nb, FPp).astype(jnp.bfloat16)

    # per-tile bf16 one-hot gather of the *projected* rows (exact for 0/1)
    a_ids = an_ref[:, 0, :]                                     # [TB, N]
    b_ids = bn_ref[:, 0, :]
    oh_a = (a_ids[:, :, None] ==
            jax.lax.broadcasted_iota(jnp.int32, (TB, N, A), 2)
            ).astype(jnp.bfloat16)                              # [TB, N, A]
    oh_b = (b_ids[:, :, None] ==
            jax.lax.broadcasted_iota(jnp.int32, (TB, N, Nb), 2)
            ).astype(jnp.bfloat16)                              # [TB, N, Nb]

    h_nei = (jnp.einsum('bna,baf->bnf', oh_a, p_na,
                        preferred_element_type=jnp.float32)
             + jnp.einsum('bnm,bmf->bnf', oh_b, p_nb,
                          preferred_element_type=jnp.float32)
             + nei_b_ref[...])
    h_nei_ref[...] = h_nei

    # ---- BN statistics: single pass, sum and sum-of-squares ----------------
    ha2 = h_atom.reshape(TB * A, FPp)
    hn2 = h_nei.reshape(TB * N, FPp)
    upd = jnp.concatenate(
        [jnp.sum(ha2, axis=0, keepdims=True),
         jnp.sum(ha2 * ha2, axis=0, keepdims=True),
         jnp.sum(hn2, axis=0, keepdims=True),
         jnp.sum(hn2 * hn2, axis=0, keepdims=True),
         jnp.zeros((4, FPp), jnp.float32)], axis=0)             # [8, FPp]
    stats_ref[...] = stats_ref[...] + upd


# --------------------------------------------------------------------------- #
# Pass 2: apply BatchNorm (batch stats over the FULL batch) + leaky_relu.     #
# --------------------------------------------------------------------------- #
def bn_act_kernel(count_atom, count_nei,
                  h_atom_ref, h_nei_ref, stats_ref,
                  atom_g_ref, atom_be_ref, nei_g_ref, nei_be_ref,
                  atom_o_ref, nei_o_ref):
    s = stats_ref[...]

    def norm(h, row, count, g, b):
        mean = s[row:row + 1, :] / count                         # [1, FPp]
        var = jnp.maximum(s[row + 1:row + 2, :] / count - mean * mean, 0.0)
        scale = jax.lax.rsqrt(var + BN_EPS) * g                  # fused scale
        shift = b - mean * scale                                 # fused shift
        return _leaky_relu(h * scale[None] + shift[None])

    atom_o_ref[...] = norm(h_atom_ref[...], 0, count_atom,
                           atom_g_ref[...], atom_be_ref[...])
    nei_o_ref[...] = norm(h_nei_ref[...], 2, count_nei,
                          nei_g_ref[...], nei_be_ref[...])


# --------------------------------------------------------------------------- #
# Wrapper                                                                      #
# --------------------------------------------------------------------------- #
def init_params(key, atom_fs, bond_fs, fp_size):
    k = jax.random.split(key, 4)
    scale_a = 1.0 / np.sqrt(atom_fs)
    scale_n = 1.0 / np.sqrt(atom_fs + bond_fs)
    return dict(
        atom_w=(jax.random.normal(k[0], (atom_fs, fp_size), jnp.float32) * scale_a),
        atom_b=(jax.random.normal(k[1], (1, fp_size), jnp.float32) * scale_a),
        atom_gamma=jnp.ones((1, fp_size), jnp.float32),
        atom_beta=jnp.zeros((1, fp_size), jnp.float32),
        nei_w=(jax.random.normal(k[2], (atom_fs + bond_fs, fp_size), jnp.float32) * scale_n),
        nei_b=(jax.random.normal(k[3], (1, fp_size), jnp.float32) * scale_n),
        nei_gamma=jnp.ones((1, fp_size), jnp.float32),
        nei_beta=jnp.zeros((1, fp_size), jnp.float32),
    )


def fp_initializer(atom_features, bond_features,
                   atom_neighbor_list, bond_neighbor_list, params,
                   tile_b=None):
    B, A, Fa = atom_features.shape
    _, Nb, Fb = bond_features.shape
    _, _, D = atom_neighbor_list.shape
    FP = params['atom_w'].shape[1]
    FPp = _round_up(FP, LANE)
    N = A * D

    if tile_b is None:
        # conservative per-block footprint; safe under default scoped VMEM on
        # v5e (16 MiB), v6e (32 MiB) and v7x (64 MiB physical / 32 MiB scoped)
        budget = 8 * 1024 * 1024
        per_b = (4.0 * (A * Fa + Nb * Fb + 2 * N + (A + N) * FPp
                        + (A + Nb) * FPp)
                 + 2.0 * N * (A + Nb) + 2.0 * (A + Nb) * FPp)
        tile_b = 1
        for t in range(B, 0, -1):
            if B % t == 0 and 2 * t * per_b <= budget:
                tile_b = t
                break
    assert B % tile_b == 0, "tile_b must divide the batch size"
    grid = (B // tile_b,)

    # zero-pad parameters to a lane-dense FP dimension; cast weights to bf16
    def padw(w):
        return jnp.pad(w.astype(jnp.bfloat16), ((0, 0), (0, FPp - FP)))

    def padv(v, fill=0.0):
        return jnp.pad(v.astype(jnp.float32), ((0, 0), (0, FPp - FP)),
                       constant_values=fill)

    atom_w = padw(params['atom_w'])
    nei_wa = padw(params['nei_w'][:Fa])           # split weight: no concat
    nei_wb = padw(params['nei_w'][Fa:])
    atom_b = padv(params['atom_b'])
    nei_b = padv(params['nei_b'])
    atom_g = padv(params['atom_gamma'], 1.0)
    atom_be = padv(params['atom_beta'])
    nei_g = padv(params['nei_gamma'], 1.0)
    nei_be = padv(params['nei_beta'])

    an = atom_neighbor_list.reshape(B, 1, N).astype(jnp.int32)
    bn = bond_neighbor_list.reshape(B, 1, N).astype(jnp.int32)

    def full(shape):
        return pl.BlockSpec(shape, lambda i, _s=len(shape): (0,) * _s)

    # ---- pass 1: projections + statistics (batch axis is a reduction for the
    #      stats accumulator -> "arbitrary") --------------------------------
    h_atom, h_nei, stats = pl.pallas_call(
        fused_proj_stats_kernel,
        grid_spec=pltpu.PrefetchScalarGridSpec(
            num_scalar_prefetch=0,
            grid=grid,
            in_specs=[
                pl.BlockSpec((tile_b, A, Fa), lambda i: (i, 0, 0)),
                pl.BlockSpec((tile_b, Nb, Fb), lambda i: (i, 0, 0)),
                pl.BlockSpec((tile_b, 1, N), lambda i: (i, 0, 0)),
                pl.BlockSpec((tile_b, 1, N), lambda i: (i, 0, 0)),
                full((Fa, FPp)), full((1, FPp)),
                full((Fa, FPp)), full((Fb, FPp)), full((1, FPp)),
            ],
            out_specs=[
                pl.BlockSpec((tile_b, A, FPp), lambda i: (i, 0, 0)),
                pl.BlockSpec((tile_b, N, FPp), lambda i: (i, 0, 0)),
                pl.BlockSpec((8, FPp), lambda i: (0, 0)),   # resident accum
            ],
        ),
        out_shape=(
            jax.ShapeDtypeStruct((B, A, FPp), jnp.float32),
            jax.ShapeDtypeStruct((B, N, FPp), jnp.float32),
            jax.ShapeDtypeStruct((8, FPp), jnp.float32),
        ),
        compiler_params=pltpu.CompilerParams(
            dimension_semantics=("arbitrary",)),
    )(atom_features, bond_features, an, bn,
      atom_w, atom_b, nei_wa, nei_wb, nei_b)

    # ---- pass 2: normalize + activation (independent per batch tile) -------
    kernel2 = functools.partial(bn_act_kernel, float(B * A), float(B * N))
    atom_o, nei_o = pl.pallas_call(
        kernel2,
        grid_spec=pltpu.PrefetchScalarGridSpec(
            num_scalar_prefetch=0,
            grid=grid,
            in_specs=[
                pl.BlockSpec((tile_b, A, FPp), lambda i: (i, 0, 0)),
                pl.BlockSpec((tile_b, N, FPp), lambda i: (i, 0, 0)),
                full((8, FPp)),
                full((1, FPp)), full((1, FPp)),
                full((1, FPp)), full((1, FPp)),
            ],
            out_specs=[
                pl.BlockSpec((tile_b, A, FPp), lambda i: (i, 0, 0)),
                pl.BlockSpec((tile_b, N, FPp), lambda i: (i, 0, 0)),
            ],
        ),
        out_shape=(
            jax.ShapeDtypeStruct((B, A, FPp), jnp.float32),
            jax.ShapeDtypeStruct((B, N, FPp), jnp.float32),
        ),
        compiler_params=pltpu.CompilerParams(
            dimension_semantics=("parallel",)),
    )(h_atom, h_nei, stats, atom_g, atom_be, nei_g, nei_be)

    atom_FP = atom_o[:, :, :FP]
    nei_FP = nei_o[:, :, :FP].reshape(B, A, D, FP)
    return atom_FP, nei_FP


# --------------------------------------------------------------------------- #
# Pure-JAX f32 reference (PyTorch train-mode semantics)                        #
# --------------------------------------------------------------------------- #
def _linear_bn_ref(x, w, b, gamma, beta):
    h = x @ w + b
    flat = h.reshape(-1, h.shape[-1])
    mean = flat.mean(0)
    var = ((flat - mean) ** 2).mean(0)          # biased variance (train mode)
    return (h - mean) / jnp.sqrt(var + BN_EPS) * gamma[0] + beta[0]


def fp_initializer_ref(af, bf, anl, bnl, p):
    B = af.shape[0]
    ga = jnp.stack([af[i][anl[i]] for i in range(B)], 0)
    gb = jnp.stack([bf[i][bnl[i]] for i in range(B)], 0)
    nei = jnp.concatenate([ga, gb], -1)
    nei = _linear_bn_ref(nei, p['nei_w'], p['nei_b'], p['nei_gamma'], p['nei_beta'])
    nei = jnp.where(nei >= 0, nei, NEG_SLOPE * nei)
    atm = _linear_bn_ref(af, p['atom_w'], p['atom_b'], p['atom_gamma'], p['atom_beta'])
    atm = jnp.where(atm >= 0, atm, NEG_SLOPE * atm)
    return atm, nei


# --------------------------------------------------------------------------- #
if __name__ == "__main__":
    key = jax.random.PRNGKey(0)
    B, A, Nb, D = 2, 8, 8, 4          # batch, atoms, bonds, max_degree
    Fa, Fb, FP = 16, 8, 32            # atom / bond feature sizes, FP_size

    kaf, kbf, kan, kbn, kp = jax.random.split(key, 5)
    atom_features = jax.random.normal(kaf, (B, A, Fa), jnp.float32)
    bond_features = jax.random.normal(kbf, (B, Nb, Fb), jnp.float32)
    atom_neighbor_list = jax.random.randint(kan, (B, A, D), 0, A, jnp.int32)
    bond_neighbor_list = jax.random.randint(kbn, (B, A, D), 0, Nb, jnp.int32)

    params = init_params(kp, Fa, Fb, FP)

    # tile_b=1 -> a 2-step batch grid, exercising the accumulate-then-normalize
    # (two-pass) BatchNorm path and the pipelined per-batch tiling.
    atom_FP, nei_FP = jax.block_until_ready(
        fp_initializer(atom_features, bond_features,
                       atom_neighbor_list, bond_neighbor_list, params,
                       tile_b=1))

    atom_ref, nei_ref = fp_initializer_ref(
        atom_features, bond_features, atom_neighbor_list, bond_neighbor_list,
        params)

    assert atom_FP.shape == (B, A, FP)
    assert nei_FP.shape == (B, A, D, FP)
    # kernel uses bf16 MXU operands (f32 accumulation); reference is pure f32,
    # so compare with a bf16-appropriate tolerance.
    np.testing.assert_allclose(np.asarray(atom_FP), np.asarray(atom_ref),
                               rtol=3e-2, atol=3e-2)
    np.testing.assert_allclose(np.asarray(nei_FP), np.asarray(nei_ref),
                               rtol=3e-2, atol=3e-2)

    print("KERNEL_OK")
</pallas_src>

<mosaic_0001>
module attributes {stable_mosaic.version = 11 : i64} {
  func.func @fused_proj_stats_kernel(%arg0: i32, %arg1: memref<1x8x16xf32, #tpu.memory_space<vmem>>, %arg2: memref<1x8x8xf32, #tpu.memory_space<vmem>>, %arg3: memref<1x1x32xi32, #tpu.memory_space<vmem>>, %arg4: memref<1x1x32xi32, #tpu.memory_space<vmem>>, %arg5: memref<16x128xbf16, #tpu.memory_space<vmem>>, %arg6: memref<1x128xf32, #tpu.memory_space<vmem>>, %arg7: memref<16x128xbf16, #tpu.memory_space<vmem>>, %arg8: memref<8x128xbf16, #tpu.memory_space<vmem>>, %arg9: memref<1x128xf32, #tpu.memory_space<vmem>>, %arg10: memref<1x8x128xf32, #tpu.memory_space<vmem>>, %arg11: memref<1x32x128xf32, #tpu.memory_space<vmem>>, %arg12: memref<8x128xf32, #tpu.memory_space<vmem>>) attributes {dimension_semantics = [#tpu.dimension_semantics<arbitrary>], iteration_bounds = array<i64: 2>, scalar_prefetch = 0 : i64, scratch_operands = 0 : i64, tpu.core_type = #tpu.core_type<tc>, window_params = [{transform_indices = @transform_0, window_bounds = array<i64: 1, 8, 16>}, {transform_indices = @transform_1, window_bounds = array<i64: 1, 8, 8>}, {transform_indices = @transform_2, window_bounds = array<i64: 1, 1, 32>}, {transform_indices = @transform_3, window_bounds = array<i64: 1, 1, 32>}, {pipeline_mode = #tpu.pipeline_mode<synchronous>, transform_indices = @transform_4, window_bounds = array<i64: 16, 128>}, {pipeline_mode = #tpu.pipeline_mode<synchronous>, transform_indices = @transform_5, window_bounds = array<i64: 1, 128>}, {pipeline_mode = #tpu.pipeline_mode<synchronous>, transform_indices = @transform_6, window_bounds = array<i64: 16, 128>}, {pipeline_mode = #tpu.pipeline_mode<synchronous>, transform_indices = @transform_7, window_bounds = array<i64: 8, 128>}, {pipeline_mode = #tpu.pipeline_mode<synchronous>, transform_indices = @transform_8, window_bounds = array<i64: 1, 128>}, {transform_indices = @transform_9, window_bounds = array<i64: 1, 8, 128>}, {transform_indices = @transform_10, window_bounds = array<i64: 1, 32, 128>}, {pipeline_mode = #tpu.pipeline_mode<synchronous>, transform_indices = @transform_11, window_bounds = array<i64: 8, 128>}]} {
    %c0_i32 = arith.constant 0 : i32
    %0 = arith.cmpi eq, %arg0, %c0_i32 : i32
    %1 = arith.extui %0 : i1 to i32
    %c0_i32_0 = arith.constant 0 : i32
    %2 = arith.cmpi ne, %1, %c0_i32_0 : i32
    scf.if %2 {
      %cst_41 = arith.constant 0.000000e+00 : f32
      %66 = vector.broadcast %cst_41 : f32 to vector<8x128xf32>
      %c0_42 = arith.constant 0 : index
      %c0_43 = arith.constant 0 : index
      %67 = vector.load %arg12[%c0_42, %c0_43] : memref<8x128xf32, #tpu.memory_space<vmem>>, vector<8x128xf32>
      tpu.vector_store %arg12[%c0_42, %c0_43], %66 {strides = array<i32>} : memref<8x128xf32, #tpu.memory_space<vmem>>, vector<8x128xf32>,
    } else {
    }
    %c0 = arith.constant 0 : index
    %c0_1 = arith.constant 0 : index
    %c0_2 = arith.constant 0 : index
    %3 = vector.load %arg1[%c0, %c0_1, %c0_2] : memref<1x8x16xf32, #tpu.memory_space<vmem>>, vector<1x8x16xf32>
    %4 = arith.truncf %3 : vector<1x8x16xf32> to vector<1x8x16xbf16>
    %5 = vector.shape_cast %4 : vector<1x8x16xbf16> to vector<8x16xbf16>
    %c0_3 = arith.constant 0 : index
    %c0_4 = arith.constant 0 : index
    %6 = vector.load %arg5[%c0_3, %c0_4] : memref<16x128xbf16, #tpu.memory_space<vmem>>, vector<16x128xbf16>
    %cst = arith.constant dense<0.000000e+00> : vector<8x128xf32>
    %7 = tpu.matmul %5, %6, %cst {dimension_numbers = #tpu.dot_dimension_numbers<[1], [0], [0], [1], [0, 0, 1, 1], [], []>} : vector<8x16xbf16>, vector<16x128xbf16>, vector<8x128xf32> -> vector<8x128xf32>
    %c0_5 = arith.constant 0 : index
    %c0_6 = arith.constant 0 : index
    %8 = vector.load %arg6[%c0_5, %c0_6] : memref<1x128xf32, #tpu.memory_space<vmem>>, vector<1x128xf32>
    %9 = vector.broadcast %8 : vector<1x128xf32> to vector<8x128xf32>
    %10 = arith.addf %7, %9 : vector<8x128xf32>
    %11 = vector.shape_cast %10 : vector<8x128xf32> to vector<1x8x128xf32>
    %c0_7 = arith.constant 0 : index
    %c0_8 = arith.constant 0 : index
    %c0_9 = arith.constant 0 : index
    %12 = vector.load %arg10[%c0_7, %c0_8, %c0_9] : memref<1x8x128xf32, #tpu.memory_space<vmem>>, vector<1x8x128xf32>
    tpu.vector_store %arg10[%c0_7, %c0_8, %c0_9], %11 {strides = array<i32>} : memref<1x8x128xf32, #tpu.memory_space<vmem>>, vector<1x8x128xf32>,
    %c0_10 = arith.constant 0 : index
    %c0_11 = arith.constant 0 : index
    %13 = vector.load %arg7[%c0_10, %c0_11] : memref<16x128xbf16, #tpu.memory_space<vmem>>, vector<16x128xbf16>
    %cst_12 = arith.constant dense<0.000000e+00> : vector<8x128xf32>
    %14 = tpu.matmul %5, %13, %cst_12 {dimension_numbers = #tpu.dot_dimension_numbers<[1], [0], [0], [1], [0, 0, 1, 1], [], []>} : vector<8x16xbf16>, vector<16x128xbf16>, vector<8x128xf32> -> vector<8x128xf32>
    %15 = vector.shape_cast %14 : vector<8x128xf32> to vector<1x8x128xf32>
    %16 = arith.truncf %15 : vector<1x8x128xf32> to vector<1x8x128xbf16>
    %c0_13 = arith.constant 0 : index
    %c0_14 = arith.constant 0 : index
    %c0_15 = arith.constant 0 : index
    %17 = vector.load %arg2[%c0_13, %c0_14, %c0_15] : memref<1x8x8xf32, #tpu.memory_space<vmem>>, vector<1x8x8xf32>
    %18 = arith.truncf %17 : vector<1x8x8xf32> to vector<1x8x8xbf16>
    %19 = vector.shape_cast %18 : vector<1x8x8xbf16> to vector<8x8xbf16>
    %c0_16 = arith.constant 0 : index
    %c0_17 = arith.constant 0 : index
    %20 = vector.load %arg8[%c0_16, %c0_17] : memref<8x128xbf16, #tpu.memory_space<vmem>>, vector<8x128xbf16>
    %cst_18 = arith.constant dense<0.000000e+00> : vector<8x128xf32>
    %21 = tpu.matmul %19, %20, %cst_18 {dimension_numbers = #tpu.dot_dimension_numbers<[1], [0], [0], [1], [0, 0, 1, 1], [], []>} : vector<8x8xbf16>, vector<8x128xbf16>, vector<8x128xf32> -> vector<8x128xf32>
    %22 = vector.shape_cast %21 : vector<8x128xf32> to vector<1x8x128xf32>
    %23 = arith.truncf %22 : vector<1x8x128xf32> to vector<1x8x128xbf16>
    %c0_19 = arith.constant 0 : index
    %c0_20 = arith.constant 0 : index
    %c0_21 = arith.constant 0 : index
    %24 = vector.load %arg3[%c0_19, %c0_20, %c0_21] : memref<1x1x32xi32, #tpu.memory_space<vmem>>, vector<1x1x32xi32>
    %25 = vector.shape_cast %24 : vector<1x1x32xi32> to vector<1x32xi32>
    %c0_22 = arith.constant 0 : index
    %c0_23 = arith.constant 0 : index
    %c0_24 = arith.constant 0 : index
    %26 = vector.load %arg4[%c0_22, %c0_23, %c0_24] : memref<1x1x32xi32, #tpu.memory_space<vmem>>, vector<1x1x32xi32>
    %27 = vector.shape_cast %26 : vector<1x1x32xi32> to vector<1x32xi32>
    %28 = vector.shape_cast %25 : vector<1x32xi32> to vector<1x32x1xi32>
    %29 = tpu.iota {dimensions = array<i32: 2>} : vector<1x32x8xi32>
    %30 = vector.broadcast %28 : vector<1x32x1xi32> to vector<1x32x8xi32>
    %31 = arith.cmpi eq, %30, %29 : vector<1x32x8xi32>
    %32 = arith.extui %31 : vector<1x32x8xi1> to vector<1x32x8xi32>
    %33 = arith.sitofp %32 : vector<1x32x8xi32> to vector<1x32x8xf32>
    %34 = arith.truncf %33 : vector<1x32x8xf32> to vector<1x32x8xbf16>
    %35 = vector.shape_cast %27 : vector<1x32xi32> to vector<1x32x1xi32>
    %36 = tpu.iota {dimensions = array<i32: 2>} : vector<1x32x8xi32>
    %37 = vector.broadcast %35 : vector<1x32x1xi32> to vector<1x32x8xi32>
    %38 = arith.cmpi eq, %37, %36 : vector<1x32x8xi32>
    %39 = arith.extui %38 : vector<1x32x8xi1> to vector<1x32x8xi32>
    %40 = arith.sitofp %39 : vector<1x32x8xi32> to vector<1x32x8xf32>
    %41 = arith.truncf %40 : vector<1x32x8xf32> to vector<1x32x8xbf16>
    "tpu.trace_start"() <{level = 10 : i32, message = "bna,baf->bnf"}> : () -> ()
    %cst_25 = arith.constant dense<0.000000e+00> : vector<1x32x128xf32>
    %42 = tpu.matmul %34, %16, %cst_25 {dimension_numbers = #tpu.dot_dimension_numbers<[2], [1], [1], [2], [0, 0, 0, 1, 1, 2], [0], [0]>} : vector<1x32x8xbf16>, vector<1x8x128xbf16>, vector<1x32x128xf32> -> vector<1x32x128xf32>
    "tpu.trace_stop"() : () -> ()
    "tpu.trace_start"() <{level = 10 : i32, message = "bnm,bmf->bnf"}> : () -> ()
    %cst_26 = arith.constant dense<0.000000e+00> : vector<1x32x128xf32>
    %43 = tpu.matmul %41, %23, %cst_26 {dimension_numbers = #tpu.dot_dimension_numbers<[2], [1], [1], [2], [0, 0, 0, 1, 1, 2], [0], [0]>} : vector<1x32x8xbf16>, vector<1x8x128xbf16>, vector<1x32x128xf32> -> vector<1x32x128xf32>
    "tpu.trace_stop"() : () -> ()
    %44 = arith.addf %42, %43 : vector<1x32x128xf32>
    %c0_27 = arith.constant 0 : index
    %c0_28 = arith.constant 0 : index
    %45 = vector.load %arg9[%c0_27, %c0_28] : memref<1x128xf32, #tpu.memory_space<vmem>>, vector<1x128xf32>
    %46 = vector.shape_cast %45 : vector<1x128xf32> to vector<1x1x128xf32>
    %47 = vector.broadcast %46 : vector<1x1x128xf32> to vector<1x32x128xf32>
    %48 = arith.addf %44, %47 : vector<1x32x128xf32>
    %c0_29 = arith.constant 0 : index
    %c0_30 = arith.constant 0 : index
    %c0_31 = arith.constant 0 : index
    %49 = vector.load %arg11[%c0_29, %c0_30, %c0_31] : memref<1x32x128xf32, #tpu.memory_space<vmem>>, vector<1x32x128xf32>
    tpu.vector_store %arg11[%c0_29, %c0_30, %c0_31], %48 {strides = array<i32>} : memref<1x32x128xf32, #tpu.memory_space<vmem>>, vector<1x32x128xf32>,
    %50 = vector.shape_cast %48 : vector<1x32x128xf32> to vector<32x128xf32>
    %cst_32 = arith.constant dense<0.000000e+00> : vector<128xf32>
    %51 = vector.multi_reduction <add>, %10, %cst_32 [0] : vector<8x128xf32> to vector<128xf32>
    %52 = vector.shape_cast %51 : vector<128xf32> to vector<1x128xf32>
    %53 = arith.mulf %10, %10 : vector<8x128xf32>
    %cst_33 = arith.constant dense<0.000000e+00> : vector<128xf32>
    %54 = vector.multi_reduction <add>, %53, %cst_33 [0] : vector<8x128xf32> to vector<128xf32>
    %55 = vector.shape_cast %54 : vector<128xf32> to vector<1x128xf32>
    %cst_34 = arith.constant dense<0.000000e+00> : vector<128xf32>
    %56 = vector.multi_reduction <add>, %50, %cst_34 [0] : vector<32x128xf32> to vector<128xf32>
    %57 = vector.shape_cast %56 : vector<128xf32> to vector<1x128xf32>
    %58 = arith.mulf %50, %50 : vector<32x128xf32>
    %cst_35 = arith.constant dense<0.000000e+00> : vector<128xf32>
    %59 = vector.multi_reduction <add>, %58, %cst_35 [0] : vector<32x128xf32> to vector<128xf32>
    %60 = vector.shape_cast %59 : vector<128xf32> to vector<1x128xf32>
    %cst_36 = arith.constant 0.000000e+00 : f32
    %61 = vector.broadcast %cst_36 : f32 to vector<4x128xf32>
    %62 = tpu.concatenate %52, %55, %57, %60, %61 in 0 : vector<1x128xf32>, vector<1x128xf32>, vector<1x128xf32>, vector<1x128xf32>, vector<4x128xf32> -> vector<8x128xf32>
    %c0_37 = arith.constant 0 : index
    %c0_38 = arith.constant 0 : index
    %63 = vector.load %arg12[%c0_37, %c0_38] : memref<8x128xf32, #tpu.memory_space<vmem>>, vector<8x128xf32>
    %64 = arith.addf %63, %62 : vector<8x128xf32>
    %c0_39 = arith.constant 0 : index
    %c0_40 = arith.constant 0 : index
    %65 = vector.load %arg12[%c0_39, %c0_40] : memref<8x128xf32, #tpu.memory_space<vmem>>, vector<8x128xf32>
    tpu.vector_store %arg12[%c0_39, %c0_40], %64 {strides = array<i32>} : memref<8x128xf32, #tpu.memory_space<vmem>>, vector<8x128xf32>,
    return
  }
  func.func @transform_0(%arg0: i32) -> (i32, i32, i32) {
    %c0_i32 = arith.constant 0 : i32
    %c0_i32_0 = arith.constant 0 : i32
    %c0_i32_1 = arith.constant 0 : i32
    return %arg0, %c0_i32, %c0_i32_0 : i32, i32, i32
  }
  func.func @transform_1(%arg0: i32) -> (i32, i32, i32) {
    %c0_i32 = arith.constant 0 : i32
    %c0_i32_0 = arith.constant 0 : i32
    %c0_i32_1 = arith.constant 0 : i32
    return %arg0, %c0_i32, %c0_i32_0 : i32, i32, i32
  }
  func.func @transform_2(%arg0: i32) -> (i32, i32, i32) {
    %c0_i32 = arith.constant 0 : i32
    %c0_i32_0 = arith.constant 0 : i32
    %c0_i32_1 = arith.constant 0 : i32
    return %arg0, %c0_i32, %c0_i32_0 : i32, i32, i32
  }
  func.func @transform_3(%arg0: i32) -> (i32, i32, i32) {
    %c0_i32 = arith.constant 0 : i32
    %c0_i32_0 = arith.constant 0 : i32
    %c0_i32_1 = arith.constant 0 : i32
    return %arg0, %c0_i32, %c0_i32_0 : i32, i32, i32
  }
  func.func @transform_4(%arg0: i32) -> (i32, i32) {
    %c0_i32 = arith.constant 0 : i32
    %c0_i32_0 = arith.constant 0 : i32
    %c0_i32_1 = arith.constant 0 : i32
    return %c0_i32, %c0_i32_0 : i32, i32
  }
  func.func @transform_5(%arg0: i32) -> (i32, i32) {
    %c0_i32 = arith.constant 0 : i32
    %c0_i32_0 = arith.constant 0 : i32
    %c0_i32_1 = arith.constant 0 : i32
    return %c0_i32, %c0_i32_0 : i32, i32
  }
  func.func @transform_6(%arg0: i32) -> (i32, i32) {
    %c0_i32 = arith.constant 0 : i32
    %c0_i32_0 = arith.constant 0 : i32
    %c0_i32_1 = arith.constant 0 : i32
    return %c0_i32, %c0_i32_0 : i32, i32
  }
  func.func @transform_7(%arg0: i32) -> (i32, i32) {
    %c0_i32 = arith.constant 0 : i32
    %c0_i32_0 = arith.constant 0 : i32
    %c0_i32_1 = arith.constant 0 : i32
    return %c0_i32, %c0_i32_0 : i32, i32
  }
  func.func @transform_8(%arg0: i32) -> (i32, i32) {
    %c0_i32 = arith.constant 0 : i32
    %c0_i32_0 = arith.constant 0 : i32
    %c0_i32_1 = arith.constant 0 : i32
    return %c0_i32, %c0_i32_0 : i32, i32
  }
  func.func @transform_9(%arg0: i32) -> (i32, i32, i32) {
    %c0_i32 = arith.constant 0 : i32
    %c0_i32_0 = arith.constant 0 : i32
    %c0_i32_1 = arith.constant 0 : i32
    return %arg0, %c0_i32, %c0_i32_0 : i32, i32, i32
  }
  func.func @transform_10(%arg0: i32) -> (i32, i32, i32) {
    %c0_i32 = arith.constant 0 : i32
    %c0_i32_0 = arith.constant 0 : i32
    %c0_i32_1 = arith.constant 0 : i32
    return %arg0, %c0_i32, %c0_i32_0 : i32, i32, i32
  }
  func.func @transform_11(%arg0: i32) -> (i32, i32) {
    %c0_i32 = arith.constant 0 : i32
    %c0_i32_0 = arith.constant 0 : i32
    %c0_i32_1 = arith.constant 0 : i32
    return %c0_i32, %c0_i32_0 : i32, i32
  }
}

</mosaic_0001>

<bundles_post_ra>
// kernel: tpu_custom_call.1
= control target key start
LH: loop header
LB: loop body
LE: loop exit
PB: predicated region body
PF: predicated region fallthrough
CT: control target
= control target key end

     0   :  { %s1967_s0 = inlined_call_operand.hbm [shape: f32[2,8,16], index: 0, kind: input, shape index: {}]   ;;  %s1968_s1 = inlined_call_operand.hbm [shape: f32[2,8,8], index: 1, kind: input, shape index: {}]   ;;  %s1969_s2 = inlined_call_operand.hbm [shape: s32[2,1,32], index: 2, kind: input, shape index: {}]   ;;  %s1970_s3 = inlined_call_operand.vmem [shape: s32[2,1,32], index: 3, kind: input, shape index: {}]   ;;  %s1971_s4 = inlined_call_operand.hbm [shape: bf16[16,128], index: 4, kind: input, shape index: {}]   ;;  %s1972_s5 = inlined_call_operand.hbm [shape: f32[1,128], index: 5, kind: input, shape index: {}]   ;;  %s1973_s6 = inlined_call_operand.hbm [shape: bf16[16,128], index: 6, kind: input, shape index: {}]   ;;  %s1974_s7 = inlined_call_operand.vmem [shape: bf16[8,128], index: 7, kind: input, shape index: {}]   ;;  %s1975_s8 = inlined_call_operand.vmem [shape: f32[1,128], index: 8, kind: input, shape index: {}]   ;;  %s1976_s9 = inlined_call_operand.hbm [shape: f32[2,8,128], index: 9, kind: output, shape index: {0}]   ;;  %s1977_s10 = inlined_call_operand.hbm [shape: f32[2,32,128], index: 10, kind: output, shape index: {1}]   ;;  %s1978_s11 = inlined_call_operand.hbm [shape: f32[8,128], index: 11, kind: output, shape index: {2}]  }
   0x1   :  { %1992 = sst [smem:[#allocation29_spill]] %s1968_s1 }
   0x2   :  { %1993 = sst [smem:[#allocation30_spill]] %s1971_s4 }
   0x3   :  { %1994 = sst [smem:[#allocation31_spill]] %s1975_s8 }
   0x4   :  { %1995 = sst [smem:[#allocation32_spill]] %s1976_s9 }
   0x5   :  { %1996 = sst [smem:[#allocation33_spill]] %s1977_s10 }
   0x6   :  { %1997 = sst [smem:[#allocation34_spill]] %s1978_s11 }
   0x7   :  { %17 = vsyncpa [#allocation3], 0 }
   0x8   :  { %19 = vsyncpa [#allocation3 + $0x1], 0 }
   0x9   :  { %20 = vsyncpa [#allocation6], 0 }
   0xa   :  { %22 = vsyncpa [#allocation6 + $0x1], 0 }
   0xb   :  { %23 = vsyncpa [#allocation9], 0 }
   0xc   :  { %24 = vsyncpa [#allocation12], 0 }
   0xd   :  { %25 = vsyncpa [#allocation4], 0 }
   0xe   :  { %27 = vsyncpa [#allocation4 + $0x1], 0 }
   0xf   :  { %28 = vsyncpa [#allocation15], 0 }
  0x10   :  { %30 = vsyncpa [#allocation15 + $0x1], 0  ;;  %s1655_s17 = smov 0   ;;  %s1657_s18 = smov 0  }
  0x11   :  { %s1659_s19 = smov 0   ;;  %s1661_s20 = smov 0  }
  0x12 LB: > { %1998 = sst [smem:[#allocation24_spill]] %s1571_s17  ;;  %s1679_s24 = sadd.s32 4294967295, %s1583_s20   ;;  %s1583_s20 = sphi %s1661_s20, %s2031_s20   ;;  %s1579_s19 = sphi %s1659_s19, %s2033_s19   ;;  %s1575_s18 = sphi %s1657_s18, %s2035_s18   ;;  %s1571_s17 = sphi %s1655_s17, %s2034_s17  }
  0x13   : > { %1999 = sst [smem:[#allocation25_spill]] %s1579_s19  ;;  %p1091_p0 = scmp.ge.s32.totalorder %s1583_s20, 1 }
  0x14   : > { %s2000_s4 = sld [smem:[#allocation30_spill]]  ;;  %p1991_p1 = scmp.eq.s32.totalorder %s1679_s24, 0 }
  0x15   : > { %p323_p2 = scmp.lt.s32.totalorder %s1583_s20, 3  ;;  %s1585_s26 = smov [#allocation8]  }
  0x16   : > { %s336_s27 = sshll.u32 %s1585_s26, 4  ;;  %s1979_s29 = smov 64   ;;  %s337_s27 = int_to_ptr.vmem [resolvable:$true] %s336_s27 }
  0x17   : > { %p1685_p4 = pnand %p1091_p0, %p323_p2  ;;  %s1981_s30 = smov 4  }
  0x18   : > { %s1980_s12 = sadd.s32 4294967294, %s1583_s20   ;;  %s1705_s13 = sadd.s32 1, %s1583_s20  }
  0x19   : > { %p1170_p5 = pneg %p1685_p4  ;;  %2003 = sst [smem:[#allocation26_spill]] %s1705_s13 }
  0x1a   : > { %s334_s23 = sshll.u32 %s2000_s4, 4  ;;  %s43_s14 = sadd.s32 1, %s1579_s19  ;;  %s335_s23 = int_to_ptr.hbm [resolvable:$true] %s334_s23 }
  0x1b   : > { %p1694_p7 = pnand %p1170_p5, %p1991_p1  ;;  %s40_s15 = ssub.s32 %s1583_s20, %s1705_s13 }
  0x1c   : > { %p50_p8 = scmp.ne.s32.totalorder %s1579_s19, %s1575_s18  ;;  %p41_p9 = scmp.eq.s32.totalorder %s40_s15, 0 }
  0x1d   : > { %1173 = dma.hbm_to_vmem [thread:$0]  (!%p1694_p7), %s335_s23, 128, %s337_s27, [#allocation9], %s1979_s29, %s1979_s29, %s1981_s30  }
  0x1e   : > { %p51_p10 = scmp.eq.s32.totalorder %s1583_s20, 0  ;;  %p56_p11 = scmp.ne.s32.totalorder %s1575_s18, %s1571_s17 }
  0x1f   : > { %p1990_p12 = scmp.eq.s32.totalorder %s1679_s24, 1  ;;  %p269_p5 = scmp.eq.s32.totalorder %s1980_s12, 1 }
  0x20   : > { %s1717_s16 = scalar_select %p41_p9, %s1579_s19, %s43_s14  }
  0x21   : > { %p52_p13 = por %p51_p10, %p50_p8  ;;  %p1721_p0 = por %p1991_p1, %p56_p11 }
  0x22   : > { %2004 = sst [smem:[#allocation27_spill]] %s1717_s16  ;;  %p1727_p2 = por %p1990_p12, %p50_p8 }
  0x23   : > { %p1200_p6 = scmp.lt.s32.totalorder %s1583_s20, 2  ;;  %s1735_s23 = sand.u32 1, %s1579_s19  }
  0x24   : > { %p1737_p9 = por %p269_p5, %p56_p11  ;;  %s1989_s27 = sshll.u32 %s1735_s23, 3 }
  0x25   : > { %s1097_s14 = sshll.u32 %s1583_s20, 3  ;;  %p1743_p10 = pnand %p1200_p6, %p52_p13 }
  0x26   : > { %s2007_s26 = scalar_select %p1737_p9, 1, 0 }
  0x27   : > { %s401_s29 = sand.u32 1, %s1583_s20   ;;  %s2010_s1 = sld [smem:[#allocation29_spill]] }
  0x28   : > { %2008 = sst [smem:[#allocation28_spill]] %s2007_s26  ;;  %s405_s16 = scalar_lea.vmem [#allocation5], %s1989_s27 }
  0x29   : > { %s413_s19 = sshll.u32 %s405_s16, 4  ;;  %s349_s11 = sshll.u32 %s1972_s5, 4  ;;  %s414_s19 = int_to_ptr.vmem [resolvable:$true] %s413_s19  ;;  %s350_s11 = int_to_ptr.hbm [resolvable:$true] %s349_s11 }
  0x2a   : > { %s1758_s10 = scalar_lea.sflag [#allocation6], %s401_s29  ;;  %p1295_p8 = pneg %p1743_p10 }
  0x2d   : > { %s409_s4 = scalar_lea.hbm %s2010_s1, %s1097_s14  ;;  %s1298_s12 = scalar_lea.hbm %s2010_s1, 16 }
  0x2e   : > { %s411_s13 = sshll.u32 %s409_s4, 4  ;;  %s412_s13 = int_to_ptr.hbm [resolvable:$true] %s411_s13 }
  0x2f   : > { %s1291_s8 = sshra.s32 %s412_s13, 4  ;;  %s1292_s8 = int_to_ptr.hbm [resolvable:$true] %s1291_s8 }
  0x30   : > { %s1293_s9 = scalar_lea.hbm %s1292_s8, 8  ;;  %p1299_p5 = scmp.lt.s32.totalorder %s1292_s8, %s2010_s1 }
  0x31   : > { %p1294_p6 = scmp.ne.s32.totalorder %s1292_s8, %s1293_s9  ;;  %p1300_p12 = scmp.lt.s32.totalorder %s1298_s12, %s1293_s9 }
  0x33   : > { %p1296_p11 = pnand %p1295_p8, %p1294_p6  ;;  %p1301_p3 = por %p1300_p12, %p1299_p5 }
  0x35   : > { %p1297_p13 = pneg %p1296_p11 }
  0x37   : > { %p1302_p1 = pnand %p1301_p3, %p1297_p13 }
  0x39   : > { %1305 = shalt.err (!%p1302_p1)
}
  0x3a   : > { %1186 = dma.hbm_to_vmem [thread:$0]  (!%p1743_p10), %s412_s13, 128, %s414_s19, %s1758_s10  }
  0x3b   : > { %s1588_s17 = smov [#allocation10]   ;;  %s360_s8 = sshll.u32 %s1973_s6, 4  ;;  %s361_s8 = int_to_ptr.hbm [resolvable:$true] %s360_s8 }
  0x3c   : > { %s351_s29 = sshll.u32 %s1588_s17, 4  ;;  %s1589_s9 = smov [#allocation11]   ;;  %s352_s29 = int_to_ptr.vmem [resolvable:$true] %s351_s29 }
  0x3d   : > { %1176 = dma.hbm_to_vmem [thread:$0]  (!%p1694_p7), %s350_s11, 16, %s352_s29, [#allocation9]  }
  0x3e   : > { %s362_s27 = sshll.u32 %s1589_s9, 4  ;;  %s390_s19 = scalar_lea.hbm %s1967_s0, %s1097_s14  ;;  %s363_s27 = int_to_ptr.vmem [resolvable:$true] %s362_s27 }
  0x3f   : > { %s2011_s13 = smov 4   ;;  %s2012_s16 = smov 64  }
  0x40   : > { %1179 = dma.hbm_to_vmem [thread:$0]  (!%p1694_p7), %s361_s8, 128, %s363_s27, [#allocation12], %s2012_s16, %s2012_s16, %s2011_s13  }
  0x41   : > { %s392_s17 = sshll.u32 %s390_s19, 4  ;;  %s2013_s26 = sshll.u32 %s1735_s23, 3  ;;  %s393_s17 = int_to_ptr.hbm [resolvable:$true] %s392_s17 }
  0x42   : > { %s386_s30 = scalar_lea.vmem [#allocation2], %s2013_s26  ;;  %s383_s11 = scalar_lea.sflag [#allocation3], %s1735_s23 }
  0x43   : > { %s394_s1 = sshll.u32 %s386_s30, 4  ;;  %s1381_s29 = sshra.s32 %s393_s17, 4  ;;  %s395_s1 = int_to_ptr.vmem [resolvable:$true] %s394_s1  ;;  %s1382_s29 = int_to_ptr.hbm [resolvable:$true] %s1381_s29 }
  0x44   : > { %s1383_s9 = scalar_lea.hbm %s1382_s29, 8  ;;  %s1388_s4 = scalar_lea.hbm %s1967_s0, 16 }
  0x45   : > { %p1384_p1 = scmp.ne.s32.totalorder %s1382_s29, %s1383_s9  ;;  %p1389_p7 = scmp.lt.s32.totalorder %s1382_s29, %s1967_s0 }
  0x46   : > { %p1390_p6 = scmp.lt.s32.totalorder %s1388_s4, %s1383_s9 }
  0x47   : > { %p1386_p3 = pnand %p1384_p1, %p1295_p8 }
  0x48   : > { %p1391_p11 = por %p1390_p6, %p1389_p7 }
  0x49   : > { %p1387_p12 = pneg %p1386_p3 }
  0x4b   : > { %p1392_p13 = pnand %p1391_p11, %p1387_p12 }
  0x4d   : > { %1395 = shalt.err (!%p1392_p13)
}
  0x4e   : > { %1183 = dma.hbm_to_vmem [thread:$0]  (!%p1743_p10), %s393_s17, 128, %s395_s1, %s383_s11  }
  0x4f   : > { %s426_s13 = scalar_lea.hbm %s1969_s2, %s1583_s20  ;;  %s423_s26 = scalar_lea.vmem [#allocation7], %s1735_s23 }
  0x50   : > { %s428_s16 = sshll.u32 %s426_s13, 4  ;;  %s430_s30 = sshll.u32 %s423_s26, 4  ;;  %s429_s16 = int_to_ptr.hbm [resolvable:$true] %s428_s16  ;;  %s431_s30 = int_to_ptr.vmem [resolvable:$true] %s430_s30 }
  0x51   : > { %s1411_s29 = sshra.s32 %s429_s16, 4  ;;  %s1418_s1 = scalar_lea.hbm %s1969_s2, 2  ;;  %s1412_s29 = int_to_ptr.hbm [resolvable:$true] %s1411_s29 }
  0x52   : > { %s1413_s9 = scalar_lea.hbm %s1412_s29, 1  ;;  %p1419_p12 = scmp.lt.s32.totalorder %s1412_s29, %s1969_s2 }
  0x53   : > { %p1414_p5 = scmp.ne.s32.totalorder %s1412_s29, %s1413_s9  ;;  %p1420_p7 = scmp.lt.s32.totalorder %s1418_s1, %s1413_s9 }
  0x55   : > { %p1416_p1 = pnand %p1414_p5, %p1295_p8  ;;  %p1421_p6 = por %p1420_p7, %p1419_p12 }
  0x57   : > { %p1417_p3 = pneg %p1416_p1 }
  0x59   : > { %p1422_p11 = pnand %p1421_p6, %p1417_p3 }
  0x5b   : > { %1425 = shalt.err (!%p1422_p11)
}
  0x5c   : > { %1189 = dma.hbm_to_vmem [thread:$0]  (!%p1743_p10), %s429_s16, 16, %s431_s30, %s1758_s10  }
  0x5d   : > { %445 = sbr.rel (%p1685_p4) target bundleno = 456 (0x1c8), region = 56  ;;  %s1823_s23 = sand.u32 (!%p1685_p4), 1, %s1575_s18  }
  0x5e   : > { %s1826_s4 = sshll.u32 (!%p1685_p4), %s1823_s23, 3  ;;  %s448_s8 = scalar_lea.sflag (!%p1685_p4), [#allocation3], %s1823_s23 }
  0x5f   : > { %s451_s27 = scalar_lea.vmem (!%p1685_p4), [#allocation2], %s1826_s4 }
  0x62   : > { %1542 = dma.done.wait (%p1721_p0), %s448_s8, 128  }
  0x63   : > { %1544 = vsyncadd (%p1721_p0), %s448_s8, 4294967168  ;;  %s457_s10 = sand.u32 1, %s1679_s24   ;;  %s461_s15 = scalar_lea.vmem [#allocation5], %s1826_s4 }
  0x64   : > { %s458_s25 = scalar_lea.sflag [#allocation6], %s457_s10 }
  0x65   : > { %1546 = dma.done.wait (%p1721_p0), %s458_s25, 144  }
  0x66   : > { %1548 = vsyncadd (%p1721_p0), %s458_s25, 4294967152  ;;  %s470_s12 = scalar_lea.vmem [#allocation7], %s1823_s23  ;;  %p2014_p4 = scmp.eq.s32.totalorder %s1679_s24, 0 }
  0x68   : > { %1550 = dma.done.wait (%p2014_p4), [#allocation9], 144   ;;  %p2015_p10 = pmov %p2014_p4 }
  0x69   : > { %p2016_p8 = pmov %p2014_p4 }
  0x6a   : > { %1552 = vsyncadd (%p2015_p10), [#allocation9], 4294967152 }
  0x6b   : > { %1554 = dma.done.wait (%p2016_p8), [#allocation12], 128   ;;  %p2017_p13 = pmov %p2014_p4 }
  0x6c   : > { %s1107_s21 = sshll.u32 %s1823_s23, 5  ;;  %p542_p0 = scmp.lt.s32.totalorder %s1679_s24, 1 }
  0x6d   : > { %1556 = vsyncadd (%p2017_p13), [#allocation12], 4294967168  ;;  %s532_s30 = scalar_lea.vmem [#allocation13], %s1826_s4  ;;  %s1861_s29 = scalar_lea.vmem [#allocation14], %s1107_s21 }
  0x6e   : > { %s1854_s19 = scalar_select %p542_p0, %s1679_s24, 1 }
  0x6f   : > { %p2018_p5 = scmp.ne.s32.totalorder %s1679_s24, 0 }
  0x70   : > { %s544_s26 = scalar_lea.vmem %s1970_s3, %s1854_s19 }
  0x71   : > { %549 = sbr.rel (%p2018_p5) target bundleno = 120 (0x78), region = 84 }
  0x76   : > { %v1590_v0 = vmov 0.0  }
  0x77   : > { %550 = vst [vmem:[#allocation16] sm:$0xff] %v1590_v0 }
  0x78 PF: > { %v607_v1 = vld [vmem:[%s1974_s7] sm:$0xf]  ;;  %vm612_vm0 = vcmask 1043456   ;;  %v633_v3 = vlaneseq  ;;  %v605_v4 = vld [vmem:[%s461_s15] sm:$0xff]  ;;  %vm608_vm1 = vcmask 64512   ;;  %vm565_vm2 = vcmask 130048  }
  0x79   : > { %v1141_v2 = vld [vmem:[#allocation8] sm:$0xff]  ;;  %v614_v5 = vsel %vm612_vm0, %v607_v1, 0  ;;  %v606_v6 = vpack.c.bf16 %v605_v4, %v605_v4  ;;  %v1142_v8 = vld [vmem:[#allocation11] sm:$0xff]  ;;  %v1257_v12 = vld [vmem:[%s544_s26] ss:$0 sm:$0xff]  ;;  %v1591_v27 = vmov 0.0  }
  0x7a   : > { %v551_v7 = vld [vmem:[%s451_s27] sm:$0xff]  ;;  %623 = vmatpush.bf16.msra.mxu2 %v614_v5  ;;  %576 = vmatpush.bf16.msra.mxu1 %v1141_v2  ;;  %v634_v9 = vshrl.u32 %v633_v3, 7  ;;  %v658_v19 = vand.u32 127, %v633_v3  ;;  %s1134_s14 = sshll.u32 %s1679_s24, 3  ;;  %s867_s1 = sshll.u32 %s532_s30, 4  ;;  %s868_s1 = int_to_ptr.vmem [resolvable:$true] %s867_s1 }
  0x7b   : > { %v552_v10 = vpack.c.bf16 %v551_v7, %v551_v7  ;;  %v1258_v13 = vld [vmem:[%s470_s12] ss:$0 sm:$0xff]  ;;  %v1259_v16 = vld [vmem:[#allocation10] ss:$0 sm:$0xff]  ;;  %s2019_s8 = sld [smem:[#allocation32_spill]]  ;;  %s850_s15 = scalar_lea.sflag [#allocation4], %s1823_s23 }
  0x7c   : > { %1251 = vset.pattern.permute.xlu1 %v634_v9  ;;  %1249 = vset.pattern.permute.xlu0 %v634_v9  ;;  %v647_v11 = vadd.s32 16, %v634_v9  ;;  %v641_v14 = vadd.s32 8, %v634_v9  ;;  %v653_v15 = vadd.s32 24, %v634_v9 }
  0x7d   : > { %1119 = vmatmul.msk.bf16.vlgmr.msra.gmra.mxu2 %vm608_vm1, %v606_v6  ;;  %1113 = vmatmul.msk.bf16.vlgmr.msra.gmra.mxu1 %vm565_vm2, %v552_v10 }
  0x7e   : > { %598 = vmatpush.bf16.msrb.mxu1 %v1142_v8  ;;  %1253 = vset.pattern.permute.xlu2 %v647_v11 }
  0x81   : > { %s865_s27 = scalar_lea.hbm %s2019_s8, %s1134_s14  ;;  %s1461_s4 = scalar_lea.hbm %s2019_s8, 16 }
  0x82   : > { %s869_s25 = sshll.u32 %s865_s27, 4  ;;  %s870_s25 = int_to_ptr.hbm [resolvable:$true] %s869_s25 }
  0x83   : > { %s1455_s12 = sshra.s32 %s870_s25, 4  ;;  %s1456_s12 = int_to_ptr.hbm [resolvable:$true] %s1455_s12 }
  0x84   : > { %680 = vperm.xlu0 %1249, %v1257_v12   ;;  %637 = vperm.xlu1 %1251, %v1258_v13   ;;  %s1457_s21 = scalar_lea.hbm %s1456_s12, 8  ;;  %p1462_p7 = scmp.lt.s32.totalorder %s1456_s12, %s2019_s8 }
  0x85   : > { %p1458_p1 = scmp.ne.s32.totalorder %s1456_s12, %s1457_s21  ;;  %p1463_p6 = scmp.lt.s32.totalorder %s1461_s4, %s1457_s21 }
  0x86   : > { %692 = vperm.xlu2 %1253, %v1257_v12  }
  0x87   : > { %p1459_p3 = pnand %p1458_p1, %p1727_p2  ;;  %p1464_p11 = por %p1463_p6, %p1462_p7 }
  0x89   : > { %p1460_p12 = pneg %p1459_p3 }
  0x8b   : > { %p1465_p4 = pnand %p1464_p11, %p1460_p12 }
  0x8c   : > { %1250 = vset.pattern.permute.xlu0 %v641_v14  ;;  %1252 = vset.pattern.permute.xlu1 %v641_v14 }
  0x8d   : > { %1118 = vmatmul.msk.bf16.vlgmr.msrb.gmra.mxu1 %vm565_vm2, %v552_v10 }
  0x8e   : > { %1254 = vset.pattern.permute.xlu2 %v653_v15 }
  0x94   : > { %686 = vperm.xlu0 %1250, %v1257_v12   ;;  %643 = vperm.xlu1 %1252, %v1258_v13  }
  0x96   : > { %698 = vperm.xlu2 %1254, %v1257_v12  }
  0x9c   : > { %1255 = vset.pattern.permute.xlu1 %v647_v11  ;;  %1256 = vset.pattern.permute.xlu0 %v653_v15 }
  0x9e   : > { %655 = vperm.xlu2 %1254, %v1258_v13  }
  0xa4   : > { %649 = vperm.xlu1 %1255, %v1258_v13  }
  0xe0   : > { %v693_v20 = vpop.permute.xlu2 %692 }
  0xe1   : > { %vm702_vm7 = vcmp.eq.s32.totalorder %v693_v20, %v658_v19 }
  0xe2   : > { %v1126_v50 = vsel %vm702_vm7, 1.0, %v1591_v27 }
  0xe3   : > { %v714_v53 = vpack.c.bf16 %v1126_v50, %v1126_v50 }
  0xe5   : > { %v722_v58 = vunpack.c.l.b16 %v714_v53 }
  0xf0   : > { %v699_v33 = vpop.permute.xlu2 %698 }
  0xf1   : > { %vm703_vm8 = vcmp.eq.s32.totalorder %v699_v33, %v658_v19 }
  0xf2   : > { %v1127_v51 = vsel %vm703_vm8, 1.0, %v1591_v27 }
  0xf3   : > { %v715_v54 = vpack.c.bf16 %v1127_v51, %v1127_v51 }
  0xf5   : > { %v723_v59 = vunpack.c.l.b16 %v715_v54 }
  0xf6   : > { %v681_v21 = vpop.permute.xlu0 %680  ;;  %v638_v22 = vpop.permute.xlu1 %637 }
  0xf7   : > { %vm700_vm3 = vcmp.eq.s32.totalorder %v681_v21, %v658_v19  ;;  %vm659_vm4 = vcmp.eq.s32.totalorder %v638_v22, %v658_v19  ;;  %v725_v0 = vpack.c.b16 %v723_v59, %v722_v58 }
  0xf8   : > { %v1124_v28 = vsel %vm700_vm3, 1.0, %v1591_v27  ;;  %v1120_v29 = vsel %vm659_vm4, 1.0, %v1591_v27  ;;  %v656_v49 = vpop.permute.xlu2 %655 }
  0xf9   : > { %v712_v32 = vpack.c.bf16 %v1124_v28, %v1124_v28  ;;  %v671_v37 = vpack.c.bf16 %v1120_v29, %v1120_v29  ;;  %vm662_vm9 = vcmp.eq.s32.totalorder %v656_v49, %v658_v19 }
  0xfa   : > { %v578_v17 = vpop.f32.mrf.mxu1  ;;  %v1123_v55 = vsel %vm662_vm9, 1.0, %v1591_v27 }
  0xfb   : > { %v1874_v18 = vadd.f32 %v1259_v16, %v578_v17  ;;  %v720_v41 = vunpack.c.l.b16 %v712_v32  ;;  %v758_v45 = vunpack.c.l.b16 %v671_v37  ;;  %v674_v60 = vpack.c.bf16 %v1123_v55, %v1123_v55 }
  0xfd   : > { %582 = vst [vmem:[%s532_s30] sm:$0xff] %v1874_v18  ;;  %v761_v63 = vunpack.c.l.b16 %v674_v60 }
 0x100   : > { %v625_v23 = vpop.f32.mrf.mxu2 }
 0x101   : > { %v629_v24 = vpack.c.bf16 %v625_v23, %v625_v23 }
 0x102   : > { %v580_v25 = vpop.f32.mrf.mxu1 }
 0x103   : > { %v733_v26 = vsel %vm612_vm0, %v629_v24, 0 }
 0x104   : > { %742 = vmatpush.bf16.msra.mxu3 %v733_v26 }
 0x106   : > { %v687_v30 = vpop.permute.xlu0 %686  ;;  %v644_v31 = vpop.permute.xlu1 %643 }
 0x107   : > { %vm701_vm5 = vcmp.eq.s32.totalorder %v687_v30, %v658_v19  ;;  %vm660_vm6 = vcmp.eq.s32.totalorder %v644_v31, %v658_v19 }
 0x108   : > { %v1125_v34 = vsel %vm701_vm5, 1.0, %v1591_v27  ;;  %v1121_v35 = vsel %vm660_vm6, 1.0, %v1591_v27  ;;  %v627_v36 = vpop.f32.mrf.mxu2 }
 0x109   : > { %v713_v38 = vpack.c.bf16 %v1125_v34, %v1125_v34  ;;  %v672_v39 = vpack.c.bf16 %v1121_v35, %v1121_v35 }
 0x10a   : > { %v600_v40 = vpop.f32.mrf.mxu1 }
 0x10b   : > { %v721_v42 = vunpack.c.l.b16 %v713_v38  ;;  %v759_v43 = vunpack.c.l.b16 %v672_v39  ;;  %v604_v44 = vpack.c.bf16 %v600_v40, %v600_v40 }
 0x10d   : > { %v724_v46 = vpack.c.b16 %v721_v42, %v720_v41  ;;  %v771_v47 = vsel %vm612_vm0, %v604_v44, 0  ;;  %v762_v48 = vpack.c.b16 %v759_v43, %v758_v45 }
 0x10e   : > { %780 = vmatpush.bf16.msra.mxu0 %v771_v47 }
 0x10f   : > { %1128 = vmatmul.msk.bf16.vlgmr.msra.gmra.mxu3 %vm608_vm1, %v724_v46 }
 0x111   : > { %1130 = vmatmul.msk.bf16.vlgmr.msra.gmra.mxu0 %vm608_vm1, %v762_v48 }
 0x112   : > { %v602_v52 = vpop.f32.mrf.mxu1 }
 0x116   : > { %v650_v56 = vpop.permute.xlu1 %649 }
 0x117   : > { %vm661_vm10 = vcmp.eq.s32.totalorder %v650_v56, %v658_v19 }
 0x118   : > { %v1122_v57 = vsel %vm661_vm10, 1.0, %v1591_v27 }
 0x119   : > { %v673_v61 = vpack.c.bf16 %v1122_v57, %v1122_v57 }
 0x11b   : > { %v760_v62 = vunpack.c.l.b16 %v673_v61 }
 0x11d   : > { %v763_v1 = vpack.c.b16 %v761_v63, %v760_v62 }
 0x11f   : > { %1129 = vmatmul.msk.bf16.gmra.mxu3 %vm608_vm1, %v725_v0 }
 0x121   : > { %1131 = vmatmul.msk.bf16.gmra.mxu0 %vm608_vm1, %v763_v1 }
 0x122   : > { %1468 = shalt.err (!%p1465_p4)
}
 0x123   : > { %1162 = dma.vmem_to_hbm [thread:$0]  (%p1727_p2), %s868_s1, 128, %s870_s25, %s850_s15   ;;  %v810_v11 = vmul.f32 %v1874_v18, %v1874_v18  ;;  %v804_v17 = vrot.slane %v1874_v18, 4 }
 0x124   : > { %s2020_s9 = sld [smem:[#allocation31_spill]]  ;;  %s1143_s28 = sshll.u32 %s1679_s24, 5 }
 0x125   : > { %v811_v15 = vrot.slane %v810_v11, 4  ;;  %s2021_s17 = sld [smem:[#allocation33_spill]]  ;;  %s881_s25 = sshll.u32 %s1861_s29, 4  ;;  %v805_v21 = vadd.f32 %v804_v17, %v1874_v18  ;;  %s1917_s25 = int_to_ptr.vmem [resolvable:$true] %s881_s25 }
 0x126   : > { %s855_s12 = scalar_lea.sflag [#allocation15], %s457_s10 }
 0x127   : > { %v812_v19 = vadd.f32 %v811_v15, %v810_v11  ;;  %v806_v32 = vrot.slane %v805_v21, 2 }
 0x129   : > { %v813_v28 = vrot.slane %v812_v19, 2 }
 0x12a   : > { %v1260_v3 = vld [vmem:[%s2020_s9] ss:$0 sm:$0xff] }
 0x12b   : > { %s2022_s11 = smov %s2021_s17  ;;  %s880_s27 = scalar_lea.hbm %s2021_s17, %s1143_s28  ;;  %v814_v35 = vadd.f32 %v813_v28, %v812_v19 }
 0x12c   : > { %s883_s15 = sshll.u32 %s880_s27, 4  ;;  %s1489_s16 = scalar_lea.hbm %s2022_s11, 64  ;;  %s1919_s15 = int_to_ptr.hbm [resolvable:$true] %s883_s15 }
 0x12d   : > { %s1483_s21 = sshra.s32 %s1919_s15, 4  ;;  %s1484_s21 = int_to_ptr.hbm [resolvable:$true] %s1483_s21 }
 0x12e   : > { %s1485_s19 = scalar_lea.hbm %s1484_s21, 32  ;;  %p1490_p0 = scmp.lt.s32.totalorder %s1484_s21, %s2022_s11 }
 0x12f   : > { %p1486_p10 = scmp.ne.s32.totalorder %s1484_s21, %s1485_s19  ;;  %p1491_p5 = scmp.lt.s32.totalorder %s1489_s16, %s1485_s19 }
 0x131   : > { %p1487_p8 = pnand %p1486_p10, %p1727_p2  ;;  %p1492_p1 = por %p1491_p5, %p1490_p0 }
 0x133   : > { %p1488_p13 = pneg %p1487_p8 }
 0x135   : > { %p1493_p3 = pnand %p1492_p1, %p1488_p13 }
 0x18e   : > { %v782_v2 = vpop.f32.mrf.mxu0 }
 0x192   : > { %v744_v4 = vpop.f32.mrf.mxu3 }
 0x193   : > { %v783_v5 = vadd.f32 %v782_v2, %v744_v4 }
 0x195   : > { %v796_v6 = vadd.f32 %v1260_v3, %v783_v5 }
 0x196   : > { %v784_v7 = vpop.f32.mrf.mxu0 }
 0x197   : > { %800 = vst [vmem:[%s1861_s29] sm:$0xff] %v796_v6  ;;  %v826_v24 = vmul.f32 %v796_v6, %v796_v6 }
 0x19a   : > { %v746_v8 = vpop.f32.mrf.mxu3 }
 0x19b   : > { %v785_v9 = vadd.f32 %v784_v7, %v746_v8 }
 0x19d   : > { %v797_v10 = vadd.f32 %v1260_v3, %v785_v9 }
 0x19e   : > { %v787_v12 = vpop.f32.mrf.mxu0 }
 0x19f   : > { %801 = vst [vmem:[%s1861_s29 + $0x8] sm:$0xff] %v797_v10  ;;  %v827_v20 = vmul.f32 %v797_v10, %v797_v10  ;;  %v817_v25 = vadd.f32 %v797_v10, %v796_v6 }
 0x1a1   : > { %v830_v29 = vadd.f32 %v827_v20, %v826_v24 }
 0x1a2   : > { %v749_v13 = vpop.f32.mrf.mxu3 }
 0x1a3   : > { %v788_v14 = vadd.f32 %v787_v12, %v749_v13 }
 0x1a5   : > { %v798_v16 = vadd.f32 %v1260_v3, %v788_v14 }
 0x1a6   : > { %v789_v22 = vpop.f32.mrf.mxu0 }
 0x1a7   : > { %802 = vst [vmem:[%s1861_s29 + $0x10] sm:$0xff] %v798_v16  ;;  %v828_v26 = vmul.f32 %v798_v16, %v798_v16  ;;  %v818_v30 = vadd.f32 %v817_v25, %v798_v16 }
 0x1a9   : > { %v831_v33 = vadd.f32 %v830_v29, %v828_v26 }
 0x1aa   : > { %v751_v23 = vpop.f32.mrf.mxu3 }
 0x1ab   : > { %v790_v27 = vadd.f32 %v789_v22, %v751_v23 }
 0x1ad   : > { %v799_v31 = vadd.f32 %v1260_v3, %v790_v27 }
 0x1af   : > { %803 = vst [vmem:[%s1861_s29 + $0x18] sm:$0xff] %v799_v31  ;;  %v819_v18 = vadd.f32 %v818_v30, %v799_v31  ;;  %v829_v34 = vmul.f32 %v799_v31, %v799_v31 }
 0x1b0   : > { %1496 = shalt.err (!%p1493_p3)
}
 0x1b1   : > { %s1592_s10 = smov 128   ;;  %s1593_s29 = smov 8   ;;  %v820_v36 = vrot.slane %v819_v18, 4  ;;  %v832_v37 = vadd.f32 %v831_v33, %v829_v34  ;;  %v807_v38 = vadd.f32 %v806_v32, %v805_v21  ;;  %v815_v41 = vrot.slane %v814_v35, 1  ;;  %v846_v56 = vld [vmem:[#allocation16] sm:$0xff] }
 0x1b2   : > { %1163 = dma.vmem_to_hbm [thread:$0]  (%p1727_p2), %s1917_s25, 512, %s1919_s15, %s855_s12, %s1592_s10, %s1592_s10, %s1593_s29   ;;  %vm839_vm11 = vcmask 1040384   ;;  %vm841_vm12 = vcmask 1041408   ;;  %vm843_vm13 = vcmask 1042432  }
 0x1b3   : > { %v821_v39 = vadd.f32 %v820_v36, %v819_v18  ;;  %v833_v40 = vrot.slane %v832_v37, 4  ;;  %v808_v44 = vrot.slane %v807_v38, 1  ;;  %v816_v47 = vadd.f32 %v815_v41, %v814_v35  ;;  %s1594_s22 = smov [#allocation16]   ;;  %s2023_s14 = sld [smem:[#allocation34_spill]] }
 0x1b4   : > { %s896_s30 = sshll.u32 %s1594_s22, 4  ;;  %p2024_p2 = scmp.eq.s32.totalorder %s1679_s24, 1  ;;  %s897_s30 = int_to_ptr.vmem [resolvable:$true] %s896_s30 }
 0x1b5   : > { %v822_v42 = vrot.slane %v821_v39, 2  ;;  %v834_v43 = vadd.f32 %v833_v40, %v832_v37  ;;  %v809_v50 = vadd.f32 %v808_v44, %v807_v38 }
 0x1b6   : > { %p2025_p12 = pmov %p2024_p2 }
 0x1b7   : > { %v823_v45 = vadd.f32 %v822_v42, %v821_v39  ;;  %v835_v46 = vrot.slane %v834_v43, 2  ;;  %v840_v53 = vsel %vm839_vm11, %v809_v50, %v816_v47 }
 0x1b9   : > { %v824_v48 = vrot.slane %v823_v45, 1  ;;  %v836_v49 = vadd.f32 %v835_v46, %v834_v43  ;;  %s898_s1 = sshll.u32 %s2023_s14, 4  ;;  %s899_s1 = int_to_ptr.hbm [resolvable:$true] %s898_s1 }
 0x1bb   : > { %v825_v51 = vadd.f32 %v824_v48, %v823_v45  ;;  %v837_v52 = vrot.slane %v836_v49, 1 }
 0x1bd   : > { %v838_v54 = vadd.f32 %v837_v52, %v836_v49  ;;  %v842_v55 = vsel %vm841_vm12, %v840_v53, %v825_v51 }
 0x1bf   : > { %v844_v57 = vsel %vm843_vm13, %v842_v55, %v838_v54 }
 0x1c0   : > { %v845_v58 = vsel %vm612_vm0, %v844_v57, 0.0 }
 0x1c1   : > { %v847_v59 = vadd.f32 %v846_v56, %v845_v58 }
 0x1c3   : > { %848 = vst [vmem:[#allocation16] sm:$0xff] %v847_v59 }
 0x1c4   : > { %1165 = dma.vmem_to_hbm [thread:$0]  (%p2024_p2), %s897_s30, 128, %s899_s1, [#allocation15]  }
 0x1c5   : > { %1558 = dma.done.wait (%p2025_p12), [#allocation15], 128   ;;  %p2026_p7 = pmov %p2024_p2 }
 0x1c7   : > { %1560 = vsyncadd (%p2026_p7), [#allocation15], 4294967168 }
 0x1c8 PF: > { %s2027_s17 = sld [smem:[#allocation24_spill]]  ;;  %p2029_p6 = scmp.ge.s32.totalorder %s1583_s20, 2 }
 0x1ca   : > { %p1191_p11 = pnand %p2029_p6, %p1737_p9 }
 0x1cc   : > { %p1192_p4 = pneg %p1191_p11 }
 0x1ce   : > { %s915_s25 = sand.u32 1, %s2027_s17  }
 0x1cf   : > { %s916_s15 = scalar_lea.sflag [#allocation4], %s915_s25 }
 0x1d0   : > { %1562 = dma.done.wait (%p1192_p4), %s916_s15, 128  }
 0x1d1   : > { %1564 = vsyncadd (%p1192_p4), %s916_s15, 4294967168  ;;  %s2030_s12 = sadd.s32 4294967294, %s1583_s20  }
 0x1d2   : > { %s925_s21 = sand.u32 1, %s2030_s12  }
 0x1d3   : > { %s926_s19 = scalar_lea.sflag [#allocation15], %s925_s21 }
 0x1d4   : > { %1566 = dma.done.wait (%p1192_p4), %s926_s19, 512  }
 0x1d5   : > { %1568 = vsyncadd (%p1192_p4), %s926_s19, 4294966784  ;;  %s2031_s20 = sld [smem:[#allocation26_spill]]  ;;  %s2034_s17 = smov %s1575_s18 }
 0x1d6   : > { %s2032_s24 = sld [smem:[#allocation25_spill]] }
 0x1d7   : > { %s2033_s19 = sld [smem:[#allocation27_spill]] }
 0x1db   : > { %p33_p10 = scmp.ge.s32.totalorder %s2031_s20, 4  }
 0x1dc   : > { %s2035_s18 = smov %s2032_s24 }
 0x1dd   :  { %35 = sbr.rel (!%p33_p10) target bundleno = 18 (0x12), region = 169 }
 0x1e2   :  { %932 = vsyncpa [#allocation3], 1 }
 0x1e3   :  { %934 = vsyncpa [#allocation3 + $0x1], 1 }
 0x1e4   :  { %935 = vsyncpa [#allocation6], 1 }
 0x1e5   :  { %937 = vsyncpa [#allocation6 + $0x1], 1 }
 0x1e6   :  { %938 = vsyncpa [#allocation9], 1 }
 0x1e7   :  { %939 = vsyncpa [#allocation12], 1 }
 0x1e8   :  { %940 = vsyncpa [#allocation4], 1 }
 0x1e9   :  { %942 = vsyncpa [#allocation4 + $0x1], 1 }
 0x1ea   :  { %943 = vsyncpa [#allocation15], 1 }
 0x1eb   :  { %945 = vsyncpa [#allocation15 + $0x1], 1 }

</bundles_post_ra>
